<compile_context>
chip_gen: v5e
topology: v5e:2x2
jax: 0.10.0
libtpu: 0.0.40
codegen_flags: <defaults>
</compile_context>

<pallas_src>
import functools

import jax
import jax.numpy as jnp
from jax.experimental import pallas as pl
from jax.experimental.pallas import tpu as pltpu


def _feature_pool_kernel(x_ref, w1t_ref, b1_ref, w2t_ref, b2_ref, o_ref,
                         acc_ref, *, inv_hw):
    """One (batch, hw-tile) grid step of forward_features + spatial mean.

    x_ref   : (1, Cin, hw_tile)  bf16  -- HW on lanes (multiple of 128)
    w1t_ref : (Chid, Cin)        bf16     b1_ref: (Chid, 1)  f32
    w2t_ref : (Cfeat, Chid)      bf16     b2_ref: (Cfeat, 1) f32
    o_ref   : (1, 1, Cfeat)      f32   -- lane-dense row, one store per batch
    acc_ref : (Cfeat, 1)         f32   -- VMEM spatial-sum accumulator
    """
    hw_idx = pl.program_id(1)

    @pl.when(hw_idx == 0)
    def _init():
        acc_ref[...] = jnp.zeros_like(acc_ref)

    xb = x_ref[0]                                          # (Cin, hw_tile) bf16

    # 1x1 conv #1 + ReLU: bf16 MXU feed, f32 accumulation, f32 pointwise.
    h1 = jnp.dot(w1t_ref[...], xb, preferred_element_type=jnp.float32)
    h1 = jnp.maximum(h1 + b1_ref[...], 0.0)                # (Chid, hw_tile) f32

    # 1x1 conv #2 + ReLU.
    f = jnp.dot(w2t_ref[...], h1.astype(jnp.bfloat16),
                preferred_element_type=jnp.float32)
    f = jnp.maximum(f + b2_ref[...], 0.0)                  # (Cfeat, hw_tile) f32

    # Partial spatial sum: cross-lane (XLU) reduce, not an MXU pooling matmul.
    acc_ref[...] += jnp.sum(f, axis=-1, keepdims=True)

    @pl.when(hw_idx == pl.num_programs(1) - 1)
    def _emit():
        pooled = acc_ref[...] * inv_hw                     # (Cfeat, 1) f32
        # One lane-dense (1, Cfeat) row store per batch.
        o_ref[...] = jnp.transpose(pooled).reshape(o_ref.shape)


def _pick_hw_tile(hw):
    # Prefer a lane-dense spatial tile (512 lanes target) that divides HW;
    # fall back to the full extent for awkward spatial sizes.
    for t in (512, 256, 128):
        if hw >= t and hw % t == 0:
            return t
    return hw


def xai_wrapper_forward(x_nchw, w1, b1, w2, b2):
    """Fused forward_features (two 1x1 convs + ReLU) + spatial mean.

    x_nchw: (N, Cin, H, W) f32  ->  (N, Cfeat) f32
    """
    n, cin, h, w = x_nchw.shape
    hw = h * w
    chid = w1.shape[1]
    cfeat = w2.shape[1]

    hw_tile = _pick_hw_tile(hw)
    num_hw = hw // hw_tile

    # Free reshape NCHW -> (N, Cin, HW); bf16 feed halves x's HBM traffic.
    x_slab = x_nchw.reshape(n, cin, hw).astype(jnp.bfloat16)
    # One-time tiny weight transposes / column biases so the kernel never
    # transposes activations.
    w1t = jnp.transpose(w1).astype(jnp.bfloat16)           # (Chid, Cin)
    w2t = jnp.transpose(w2).astype(jnp.bfloat16)           # (Cfeat, Chid)
    b1c = b1.reshape(chid, 1).astype(jnp.float32)
    b2c = b2.reshape(cfeat, 1).astype(jnp.float32)

    # Cost estimate consistent with bf16 inputs / f32 biases+output.
    flops = 2 * n * hw * (cin * chid + chid * cfeat) + n * hw * cfeat
    bytes_accessed = (2 * (x_slab.size + w1t.size + w2t.size)
                      + 4 * (b1c.size + b2c.size + n * cfeat))
    cost = pl.CostEstimate(flops=flops, transcendentals=0,
                           bytes_accessed=bytes_accessed)

    kernel = functools.partial(_feature_pool_kernel, inv_hw=1.0 / hw)

    grid_spec = pltpu.PrefetchScalarGridSpec(
        num_scalar_prefetch=0,
        # Batch on a 'parallel' axis (megacore sharding on v7x); spatial tiles
        # on a trailing 'arbitrary' reduction axis (pipelined x DMAs).
        grid=(n, num_hw),
        in_specs=[
            pl.BlockSpec((1, cin, hw_tile), lambda b, k: (b, 0, k)),
            pl.BlockSpec((chid, cin), lambda b, k: (0, 0)),
            pl.BlockSpec((chid, 1), lambda b, k: (0, 0)),
            pl.BlockSpec((cfeat, chid), lambda b, k: (0, 0)),
            pl.BlockSpec((cfeat, 1), lambda b, k: (0, 0)),
        ],
        out_specs=pl.BlockSpec((1, 1, cfeat), lambda b, k: (b, 0, 0)),
        scratch_shapes=[pltpu.VMEM((cfeat, 1), jnp.float32)],
    )

    out = pl.pallas_call(
        kernel,
        out_shape=jax.ShapeDtypeStruct((n, 1, cfeat), jnp.float32),
        grid_spec=grid_spec,
        compiler_params=pltpu.CompilerParams(
            dimension_semantics=("parallel", "arbitrary"),
            # Explicit scoped-VMEM budget: fits every generation's physical
            # VMEM; the per-step working set here is a few hundred KiB.
            vmem_limit_bytes=32 * 1024 * 1024,
        ),
        cost_estimate=cost,
    )(x_slab, w1t, b1c, w2t, b2c)

    # (N, 1, Cfeat) -> (N, Cfeat): drops a unit dim, no data movement.
    return out.reshape(n, cfeat)


def _reference_f32(x_nchw, w1, b1, w2, b2):
    n, cin, h, w = x_nchw.shape
    x_pix = jnp.transpose(x_nchw, (0, 2, 3, 1)).reshape(n, h * w, cin)
    h1 = jnp.maximum(jnp.einsum("npc,cd->npd", x_pix, w1) + b1, 0.0)
    f = jnp.maximum(jnp.einsum("npd,de->npe", h1, w2) + b2, 0.0)
    return jnp.mean(f, axis=1)


def _reference_bf16(x_nchw, w1, b1, w2, b2):
    # Same numerics as the kernel: bf16 matmul inputs, f32 accum / pointwise.
    n, cin, h, w = x_nchw.shape
    x_pix = jnp.transpose(x_nchw, (0, 2, 3, 1)).reshape(n, h * w, cin)
    h1 = jnp.einsum("npc,cd->npd", x_pix.astype(jnp.bfloat16),
                    w1.astype(jnp.bfloat16),
                    preferred_element_type=jnp.float32)
    h1 = jnp.maximum(h1 + b1, 0.0)
    f = jnp.einsum("npd,de->npe", h1.astype(jnp.bfloat16),
                   w2.astype(jnp.bfloat16),
                   preferred_element_type=jnp.float32)
    f = jnp.maximum(f + b2, 0.0)
    return jnp.mean(f, axis=1)


if __name__ == "__main__":
    # Small shapes consistent with the wrapper's forward: NCHW image batch.
    # H = W = 32 -> HW = 1024, so the spatial grid axis runs 2 reduction steps
    # (hw_tile = 512) and exercises the accumulator path.
    N, CIN, H, W = 2, 4, 32, 32
    CHID, CFEAT = 32, 32

    key = jax.random.PRNGKey(0)
    k_x, k_w1, k_b1, k_w2, k_b2 = jax.random.split(key, 5)

    x = jax.random.normal(k_x, (N, CIN, H, W), dtype=jnp.float32)
    # Deterministic synthetic "forward_features" parameters.
    w1 = 0.1 * jax.random.normal(k_w1, (CIN, CHID), dtype=jnp.float32)
    b1 = 0.1 * jax.random.normal(k_b1, (CHID,), dtype=jnp.float32)
    w2 = 0.1 * jax.random.normal(k_w2, (CHID, CFEAT), dtype=jnp.float32)
    b2 = 0.1 * jax.random.normal(k_b2, (CFEAT,), dtype=jnp.float32)

    out = xai_wrapper_forward(x, w1, b1, w2, b2)
    out = jax.block_until_ready(out)
    assert out.shape == (N, CFEAT), out.shape

    ref_bf16 = _reference_bf16(x, w1, b1, w2, b2)
    ref_f32 = _reference_f32(x, w1, b1, w2, b2)
    assert jnp.allclose(out, ref_bf16, atol=5e-4, rtol=5e-4), \
        "mismatch vs bf16-matched reference"
    assert jnp.allclose(out, ref_f32, atol=3e-2, rtol=3e-2), \
        "mismatch vs f32 reference"

    print("KERNEL_OK")
</pallas_src>

<mosaic_0001>
module attributes {stable_mosaic.version = 11 : i64} {
  func.func @_feature_pool_kernel(%arg0: i32, %arg1: i32, %arg2: memref<1x4x512xbf16, #tpu.memory_space<vmem>>, %arg3: memref<32x4xbf16, #tpu.memory_space<vmem>>, %arg4: memref<32x1xf32, #tpu.memory_space<vmem>>, %arg5: memref<32x32xbf16, #tpu.memory_space<vmem>>, %arg6: memref<32x1xf32, #tpu.memory_space<vmem>>, %arg7: memref<1x1x32xf32, #tpu.memory_space<vmem>>, %arg8: memref<32x1xf32, #tpu.memory_space<vmem>>) attributes {dimension_semantics = [#tpu.dimension_semantics<parallel>, #tpu.dimension_semantics<arbitrary>], iteration_bounds = array<i64: 2, 2>, scalar_prefetch = 0 : i64, scratch_operands = 1 : i64, tpu.core_type = #tpu.core_type<tc>, window_params = [{transform_indices = @transform_0, window_bounds = array<i64: 1, 4, 512>}, {pipeline_mode = #tpu.pipeline_mode<synchronous>, transform_indices = @transform_1, window_bounds = array<i64: 32, 4>}, {pipeline_mode = #tpu.pipeline_mode<synchronous>, transform_indices = @transform_2, window_bounds = array<i64: 32, 1>}, {pipeline_mode = #tpu.pipeline_mode<synchronous>, transform_indices = @transform_3, window_bounds = array<i64: 32, 32>}, {pipeline_mode = #tpu.pipeline_mode<synchronous>, transform_indices = @transform_4, window_bounds = array<i64: 32, 1>}, {transform_indices = @transform_5, window_bounds = array<i64: 1, 1, 32>}]} {
    %c0_i32 = arith.constant 0 : i32
    %0 = arith.cmpi eq, %arg1, %c0_i32 : i32
    %1 = arith.extui %0 : i1 to i32
    %c0_i32_0 = arith.constant 0 : i32
    %2 = arith.cmpi ne, %1, %c0_i32_0 : i32
    scf.if %2 {
      %cst_20 = arith.constant 0.000000e+00 : f32
      %28 = vector.broadcast %cst_20 : f32 to vector<32x1xf32>
      %c0_21 = arith.constant 0 : index
      %c0_22 = arith.constant 0 : index
      %29 = vector.load %arg8[%c0_21, %c0_22] : memref<32x1xf32, #tpu.memory_space<vmem>>, vector<32x1xf32>
      tpu.vector_store %arg8[%c0_21, %c0_22], %28 {strides = array<i32>} : memref<32x1xf32, #tpu.memory_space<vmem>>, vector<32x1xf32>,
    } else {
    }
    %c0 = arith.constant 0 : index
    %c0_1 = arith.constant 0 : index
    %c0_2 = arith.constant 0 : index
    %3 = vector.load %arg2[%c0, %c0_1, %c0_2] : memref<1x4x512xbf16, #tpu.memory_space<vmem>>, vector<1x4x512xbf16>
    %4 = vector.shape_cast %3 : vector<1x4x512xbf16> to vector<4x512xbf16>
    %c0_3 = arith.constant 0 : index
    %c0_4 = arith.constant 0 : index
    %5 = vector.load %arg3[%c0_3, %c0_4] : memref<32x4xbf16, #tpu.memory_space<vmem>>, vector<32x4xbf16>
    %cst = arith.constant dense<0.000000e+00> : vector<32x512xf32>
    %6 = tpu.matmul %5, %4, %cst {dimension_numbers = #tpu.dot_dimension_numbers<[1], [0], [0], [1], [0, 0, 1, 1], [], []>} : vector<32x4xbf16>, vector<4x512xbf16>, vector<32x512xf32> -> vector<32x512xf32>
    %c0_5 = arith.constant 0 : index
    %c0_6 = arith.constant 0 : index
    %7 = vector.load %arg4[%c0_5, %c0_6] : memref<32x1xf32, #tpu.memory_space<vmem>>, vector<32x1xf32>
    %8 = vector.broadcast %7 : vector<32x1xf32> to vector<32x512xf32>
    %9 = arith.addf %6, %8 : vector<32x512xf32>
    %cst_7 = arith.constant 0.000000e+00 : f32
    %10 = vector.broadcast %cst_7 : f32 to vector<32x512xf32>
    %11 = arith.maximumf %9, %10 : vector<32x512xf32>
    %c0_8 = arith.constant 0 : index
    %c0_9 = arith.constant 0 : index
    %12 = vector.load %arg5[%c0_8, %c0_9] : memref<32x32xbf16, #tpu.memory_space<vmem>>, vector<32x32xbf16>
    %13 = arith.truncf %11 : vector<32x512xf32> to vector<32x512xbf16>
    %cst_10 = arith.constant dense<0.000000e+00> : vector<32x512xf32>
    %14 = tpu.matmul %12, %13, %cst_10 {dimension_numbers = #tpu.dot_dimension_numbers<[1], [0], [0], [1], [0, 0, 1, 1], [], []>} : vector<32x32xbf16>, vector<32x512xbf16>, vector<32x512xf32> -> vector<32x512xf32>
    %c0_11 = arith.constant 0 : index
    %c0_12 = arith.constant 0 : index
    %15 = vector.load %arg6[%c0_11, %c0_12] : memref<32x1xf32, #tpu.memory_space<vmem>>, vector<32x1xf32>
    %16 = vector.broadcast %15 : vector<32x1xf32> to vector<32x512xf32>
    %17 = arith.addf %14, %16 : vector<32x512xf32>
    %cst_13 = arith.constant 0.000000e+00 : f32
    %18 = vector.broadcast %cst_13 : f32 to vector<32x512xf32>
    %19 = arith.maximumf %17, %18 : vector<32x512xf32>
    %c0_14 = arith.constant 0 : index
    %c0_15 = arith.constant 0 : index
    %20 = vector.load %arg8[%c0_14, %c0_15] : memref<32x1xf32, #tpu.memory_space<vmem>>, vector<32x1xf32>
    %cst_16 = arith.constant dense<0.000000e+00> : vector<32xf32>
    %21 = vector.multi_reduction <add>, %19, %cst_16 [1] : vector<32x512xf32> to vector<32xf32>
    %22 = vector.shape_cast %21 : vector<32xf32> to vector<32x1xf32>
    %23 = arith.addf %20, %22 : vector<32x1xf32>
    %c0_17 = arith.constant 0 : index
    %c0_18 = arith.constant 0 : index
    %24 = vector.load %arg8[%c0_17, %c0_18] : memref<32x1xf32, #tpu.memory_space<vmem>>, vector<32x1xf32>
    tpu.vector_store %arg8[%c0_17, %c0_18], %23 {strides = array<i32>} : memref<32x1xf32, #tpu.memory_space<vmem>>, vector<32x1xf32>,
    %c1_i32 = arith.constant 1 : i32
    %25 = arith.cmpi eq, %arg1, %c1_i32 : i32
    %26 = arith.extui %25 : i1 to i32
    %c0_i32_19 = arith.constant 0 : i32
    %27 = arith.cmpi ne, %26, %c0_i32_19 : i32
    scf.if %27 {
      %c0_20 = arith.constant 0 : index
      %c0_21 = arith.constant 0 : index
      %28 = vector.load %arg8[%c0_20, %c0_21] : memref<32x1xf32, #tpu.memory_space<vmem>>, vector<32x1xf32>
      %cst_22 = arith.constant 9.765625E-4 : f32
      %29 = vector.broadcast %cst_22 : f32 to vector<32x1xf32>
      %30 = arith.mulf %28, %29 : vector<32x1xf32>
      %31 = tpu.transpose %30, [1, 0] : vector<32x1xf32> -> vector<1x32xf32>
      %32 = vector.shape_cast %31 : vector<1x32xf32> to vector<1x1x32xf32>
      %c0_23 = arith.constant 0 : index
      %c0_24 = arith.constant 0 : index
      %c0_25 = arith.constant 0 : index
      %33 = vector.load %arg7[%c0_23, %c0_24, %c0_25] : memref<1x1x32xf32, #tpu.memory_space<vmem>>, vector<1x1x32xf32>
      tpu.vector_store %arg7[%c0_23, %c0_24, %c0_25], %32 {strides = array<i32>} : memref<1x1x32xf32, #tpu.memory_space<vmem>>, vector<1x1x32xf32>,
    } else {
    }
    return
  }
  func.func @transform_0(%arg0: i32, %arg1: i32) -> (i32, i32, i32) {
    %c0_i32 = arith.constant 0 : i32
    %c0_i32_0 = arith.constant 0 : i32
    return %arg0, %c0_i32, %arg1 : i32, i32, i32
  }
  func.func @transform_1(%arg0: i32, %arg1: i32) -> (i32, i32) {
    %c0_i32 = arith.constant 0 : i32
    %c0_i32_0 = arith.constant 0 : i32
    %c0_i32_1 = arith.constant 0 : i32
    return %c0_i32, %c0_i32_0 : i32, i32
  }
  func.func @transform_2(%arg0: i32, %arg1: i32) -> (i32, i32) {
    %c0_i32 = arith.constant 0 : i32
    %c0_i32_0 = arith.constant 0 : i32
    %c0_i32_1 = arith.constant 0 : i32
    return %c0_i32, %c0_i32_0 : i32, i32
  }
  func.func @transform_3(%arg0: i32, %arg1: i32) -> (i32, i32) {
    %c0_i32 = arith.constant 0 : i32
    %c0_i32_0 = arith.constant 0 : i32
    %c0_i32_1 = arith.constant 0 : i32
    return %c0_i32, %c0_i32_0 : i32, i32
  }
  func.func @transform_4(%arg0: i32, %arg1: i32) -> (i32, i32) {
    %c0_i32 = arith.constant 0 : i32
    %c0_i32_0 = arith.constant 0 : i32
    %c0_i32_1 = arith.constant 0 : i32
    return %c0_i32, %c0_i32_0 : i32, i32
  }
  func.func @transform_5(%arg0: i32, %arg1: i32) -> (i32, i32, i32) {
    %c0_i32 = arith.constant 0 : i32
    %c0_i32_0 = arith.constant 0 : i32
    %c0_i32_1 = arith.constant 0 : i32
    return %arg0, %c0_i32, %c0_i32_0 : i32, i32, i32
  }
}

</mosaic_0001>

<bundles_post_ra>
// kernel: tpu_custom_call.1
= control target key start
LH: loop header
LB: loop body
LE: loop exit
PB: predicated region body
PF: predicated region fallthrough
CT: control target
= control target key end

     0   :  { %10 = vsyncpa [#allocation4], 0  ;;  %s1155_s0 = inlined_call_operand.vmem [shape: bf16[2,4,1024], index: 0, kind: input, shape index: {}]   ;;  %s1156_s1 = inlined_call_operand.vmem [shape: bf16[32,4], index: 1, kind: input, shape index: {}]   ;;  %s1157_s2 = inlined_call_operand.vmem [shape: f32[32,1], index: 2, kind: input, shape index: {}]   ;;  %s1158_s3 = inlined_call_operand.vmem [shape: bf16[32,32], index: 3, kind: input, shape index: {}]   ;;  %s1159_s4 = inlined_call_operand.vmem [shape: f32[32,1], index: 4, kind: input, shape index: {}]   ;;  %s1160_s5 = inlined_call_operand.hbm [shape: f32[2,1,32], index: 5, kind: output, shape index: {}]  }
   0x1   :  { %12 = vsyncpa [#allocation4 + $0x1], 0  ;;  %s975_s18 = smov 0   ;;  %s977_s19 = smov 0  }
   0x2   :  { %s979_s20 = smov 0   ;;  %s981_s21 = smov 0  }
   0x3   :  { %s983_s22 = smov 0   ;;  %s985_s23 = smov 0  }
   0x4   :  { %s987_s24 = smov 0   ;;  %s989_s25 = smov 0  }
   0x5 LB: > { %s722_s26 = sadd.s32 4294967295, %s941_s25   ;;  %s723_s27 = sadd.s32 4294967294, %s941_s25   ;;  %s941_s25 = sphi %s989_s25, %s18_s25   ;;  %s937_s24 = sphi %s987_s24, %s1169_s24   ;;  %s933_s23 = sphi %s985_s23, %s1168_s23   ;;  %s929_s22 = sphi %s983_s22, %s1167_s22   ;;  %s925_s21 = sphi %s981_s21, %s1166_s21   ;;  %s921_s20 = sphi %s979_s20, %s1165_s20   ;;  %s917_s19 = sphi %s977_s19, %s1164_s19   ;;  %s913_s18 = sphi %s975_s18, %s1163_s18  }
   0x6   : > { %s27_s28 = sadd.s32 1, %s933_s23  ;;  %s30_s29 = sadd.s32 1, %s937_s24 }
   0x7   : > { %p28_p0 = scmp.ge.s32.totalorder %s27_s28, 2  ;;  %p159_p1 = scmp.ne.s32.totalorder %s921_s20, %s917_s19 }
   0x8   : > { %p160_p2 = scmp.eq.s32.totalorder %s722_s26, 3  ;;  %p165_p4 = scmp.ne.s32.totalorder %s917_s19, %s913_s18 }
   0x9   : > { %s1171_s28 = smov (%p28_p0, %s27_s28), 0  ;;  %s1173_s29 = smov (!%p28_p0, %s30_s29), %s937_s24 }
   0xa   : > { %p1024_p3 = por %p160_p2, %p159_p1  ;;  %p32_p5 = scmp.ge.s32.totalorder %s1173_s29, 2 }
   0xb   : > { %p166_p6 = scmp.eq.s32.totalorder %s723_s27, 3  ;;  %p726_p7 = scmp.ge.s32.totalorder %s941_s25, 1 }
   0xc   : > { %p209_p8 = scmp.lt.s32.totalorder %s941_s25, 5  ;;  %s1175_s29 = smov (%p32_p5, %s1173_s29), 0 }
   0xd   : > { %p1034_p9 = por %p166_p6, %p165_p4  ;;  %s146_s7 = ssub.s32 %s937_s24, %s1175_s29 }
   0xe   : > { %p210_p10 = pnand %p726_p7, %p209_p8  ;;  %s149_s8 = sadd.s32 1, %s921_s20 }
   0xf   : > { %p147_p11 = scmp.eq.s32.totalorder %s146_s7, 0  ;;  %s238_s10 = sand.u32 (!%p210_p10), 1, %s917_s19  }
  0x10   : > { %213 = sbr.rel (%p210_p10) target bundleno = 681 (0x2a9), region = 40  ;;  %s727_s11 = sshll.u32 (!%p210_p10), %s925_s21, 2 }
  0x11   : > { %s1042_s9 = scalar_select %p147_p11, %s921_s20, %s149_s8  }
  0x12   : > { %p241_p12 = scmp.lt.s32.totalorder (!%p210_p10), %s929_s22, 1  ;;  %p243_p13 = scmp.lt.s32.totalorder (!%p210_p10), %s727_s11, 7 }
  0x13   : > { %s1053_s27 = scalar_lea.vmem (!%p210_p10), [#allocation3], %s238_s10  ;;  %p730_p0 = scmp.ne.s32.totalorder (!%p210_p10), %s925_s21, 0 }
  0x15   : > { %s242_s12 = scalar_select %p241_p12, %s929_s22, 1 }
  0x16   : > { %s1177_s11 = smov (!%p243_p13, %s727_s11), 7  ;;  %254 = sbr.rel (%p730_p0) target bundleno = 32 (0x20), region = 44 }
  0x17   : > { %s728_s13 = sshll.u32 %s242_s12, 3 }
  0x18   : > { %s246_s14 = sadd.s32 %s728_s13, %s1177_s11 }
  0x19   : > { %s729_s15 = sshll.u32 %s246_s14, 1 }
  0x1a   : > { %s248_s26 = scalar_lea.vmem %s1155_s0, %s729_s15 }
  0x1b   : > { %vm255_vm0 = vcmask 7168   ;;  %v943_v0 = vmov 0.0  }
  0x1c   : > { %256 = vst.msk [vmem:[#allocation2] sm:$0xff] %vm255_vm0, %v943_v0 }
  0x1d   : > { %257 = vst.msk [vmem:[#allocation2 + $0x8] sm:$0xff] %vm255_vm0, %v943_v0 }
  0x1e   : > { %258 = vst.msk [vmem:[#allocation2 + $0x10] sm:$0xff] %vm255_vm0, %v943_v0 }
  0x1f   : > { %259 = vst.msk [vmem:[#allocation2 + $0x18] sm:$0xff] %vm255_vm0, %v943_v0 }
  0x20 PF: > { %v260_v1 = vld [vmem:[%s248_s26] sm:$0xff]  ;;  %v944_v3 = vmov 0   ;;  %v267_v4 = vld [vmem:[%s1157_s2 + $0x10] sm:$0xff]  ;;  %vm312_vm1 = vcmask 1041408   ;;  %v266_v6 = vld [vmem:[%s1157_s2 + $0x8] sm:$0xff]  ;;  %vm305_vm2 = vcmask 31744  }
  0x21   : > { %v265_v2 = vld [vmem:[%s1157_s2] sm:$0xff]  ;;  %300 = vst [vmem:[#allocation1] ss:$4 sm:$0xff] %v260_v1  ;;  %845 = vset.pattern.permute.xlu1 %v944_v3  ;;  %844 = vset.pattern.permute.xlu0 %v944_v3  ;;  %v268_v12 = vld [vmem:[%s1157_s2 + $0x18] sm:$0xff]  ;;  %v427_v17 = vld [vmem:[%s1159_s4 + $0x10] sm:$0xff]  ;;  %vm459_vm3 = vcmask 261120  }
  0x22   : > { %271 = vperm.xlu1 %845, %v265_v2   ;;  %281 = vperm.xlu0 %844, %v267_v4   ;;  %v766_v5 = vld [vmem:[%s1156_s1] sm:$0xff]  ;;  %v428_v16 = vld [vmem:[%s1159_s4 + $0x18] sm:$0xff]  ;;  %v767_v18 = vld [vmem:[%s1156_s1 + $0x8] sm:$0xff]  ;;  %vm586_vm4 = vcmask 7168   ;;  %p763_p1 = scmp.ne.s32.totalorder %s925_s21, 1 }
  0x23   : > { %846 = vset.pattern.permute.xlu2 %v944_v3  ;;  %v425_v56 = vld [vmem:[%s1159_s4] sm:$0xff] }
  0x24   : > { %431 = vperm.xlu2 %846, %v425_v56  }
  0x28   : > { %v301_v7 = vld.sshfl [vmem:[#allocation1] sm:$0xff pattern:$0x73625140]  ;;  %v302_v8 = vld.sshfl [vmem:[#allocation1 + $0x8] sm:$0xff pattern:$0x73625140] }
  0x29   : > { %v313_v9 = vsel %vm312_vm1, %v301_v7, 0  ;;  %v315_v10 = vsel %vm312_vm1, %v302_v8, 0  ;;  %v303_v11 = vld.sshfl [vmem:[#allocation1 + $0x10] sm:$0xff pattern:$0x73625140] }
  0x2a   : > { %328 = vmatpush.bf16.msra.mxu0 %v313_v9  ;;  %347 = vmatpush.bf16.msra.mxu1 %v315_v10  ;;  %v317_v13 = vsel %vm312_vm1, %v303_v11, 0  ;;  %v304_v14 = vld.sshfl [vmem:[#allocation1 + $0x18] sm:$0xff pattern:$0x73625140] }
  0x2b   : > { %366 = vmatpush.bf16.msra.mxu2 %v317_v13  ;;  %v319_v15 = vsel %vm312_vm1, %v304_v14, 0  ;;  %276 = vperm.xlu1 %845, %v266_v6   ;;  %v426_v13 = vld [vmem:[%s1159_s4 + $0x8] sm:$0xff] }
  0x2c   : > { %385 = vmatpush.bf16.msra.mxu3 %v319_v15  ;;  %286 = vperm.xlu0 %844, %v268_v12  }
  0x2d   : > { %739 = vmatmul.msk.bf16.vlgmr.msra.gmra.mxu0 %vm305_vm2, %v766_v5  ;;  %741 = vmatmul.msk.bf16.vlgmr.msra.gmra.mxu1 %vm305_vm2, %v766_v5 }
  0x2e   : > { %743 = vmatmul.msk.bf16.vlgmr.msra.gmra.mxu2 %vm305_vm2, %v766_v5  ;;  %436 = vperm.xlu2 %846, %v426_v13  }
  0x2f   : > { %745 = vmatmul.msk.bf16.vlgmr.msra.gmra.mxu3 %vm305_vm2, %v766_v5  ;;  %v768_v5 = vld [vmem:[%s1158_s3] sm:$0xff] }
  0x33   : > { %446 = vperm.xlu1 %845, %v428_v16  }
  0x34   : > { %441 = vperm.xlu0 %844, %v427_v17  }
  0x3d   : > { %740 = vmatmul.msk.bf16.gmra.mxu0 %vm305_vm2, %v767_v18  ;;  %742 = vmatmul.msk.bf16.gmra.mxu1 %vm305_vm2, %v767_v18 }
  0x3e   : > { %744 = vmatmul.msk.bf16.gmra.mxu2 %vm305_vm2, %v767_v18 }
  0x3f   : > { %746 = vmatmul.msk.bf16.gmra.mxu3 %vm305_vm2, %v767_v18  ;;  %v769_v18 = vld [vmem:[%s1158_s3 + $0x8] sm:$0xff] }
  0x94   : > { %v272_v25 = vpop.permute.xlu1 %271  ;;  %v282_v26 = vpop.permute.xlu0 %281 }
  0x9d   : > { %v277_v31 = vpop.permute.xlu1 %276 }
  0x9e   : > { %v287_v32 = vpop.permute.xlu0 %286 }
  0xaa   : > { %v330_v19 = vpop.f32.mrf.mxu0  ;;  %v349_v20 = vpop.f32.mrf.mxu1 }
  0xab   : > { %v331_v40 = vadd.f32 %v330_v19, %v272_v25  ;;  %v350_v43 = vadd.f32 %v349_v20, %v272_v25 }
  0xad   : > { %v397_v50 = vmax.f32 %v331_v40, 0.0  ;;  %v398_v54 = vmax.f32 %v350_v43, 0.0 }
  0xb1   : > { %v368_v21 = vpop.f32.mrf.mxu2 }
  0xb2   : > { %v387_v22 = vpop.f32.mrf.mxu3  ;;  %v332_v23 = vpop.f32.mrf.mxu0  ;;  %v369_v1 = vadd.f32 %v368_v21, %v272_v25 }
  0xb3   : > { %v351_v24 = vpop.f32.mrf.mxu1  ;;  %v333_v41 = vadd.f32 %v332_v23, %v277_v31  ;;  %v388_v6 = vadd.f32 %v387_v22, %v272_v25  ;;  %v432_v21 = vpop.permute.xlu2 %431 }
  0xb4   : > { %v352_v44 = vadd.f32 %v351_v24, %v277_v31  ;;  %v399_v14 = vmax.f32 %v369_v1, 0.0 }
  0xb5   : > { %v401_v51 = vmax.f32 %v333_v41, 0.0  ;;  %v400_v15 = vmax.f32 %v388_v6, 0.0 }
  0xb6   : > { %v402_v55 = vmax.f32 %v352_v44, 0.0 }
  0xb7   : > { %v417_v0 = vpack.c.bf16 %v401_v51, %v397_v50 }
  0xb8   : > { %v418_v4 = vpack.c.bf16 %v402_v55, %v398_v54 }
  0xb9   : > { %v370_v27 = vpop.f32.mrf.mxu2 }
  0xba   : > { %v389_v28 = vpop.f32.mrf.mxu3  ;;  %v335_v29 = vpop.f32.mrf.mxu0  ;;  %v371_v59 = vadd.f32 %v370_v27, %v277_v31 }
  0xbb   : > { %v354_v30 = vpop.f32.mrf.mxu1  ;;  %v336_v33 = vadd.f32 %v335_v29, %v282_v26  ;;  %v390_v62 = vadd.f32 %v389_v28, %v277_v31  ;;  %v437_v29 = vpop.permute.xlu2 %436 }
  0xbc   : > { %v355_v35 = vadd.f32 %v354_v30, %v282_v26  ;;  %v403_v9 = vmax.f32 %v371_v59, 0.0 }
  0xbd   : > { %v405_v45 = vmax.f32 %v336_v33, 0.0  ;;  %v404_v11 = vmax.f32 %v390_v62, 0.0 }
  0xbe   : > { %v406_v47 = vmax.f32 %v355_v35, 0.0  ;;  %v419_v16 = vpack.c.bf16 %v403_v9, %v399_v14 }
  0xbf   : > { %v420_v17 = vpack.c.bf16 %v404_v11, %v400_v15 }
  0xc1   : > { %v373_v34 = vpop.f32.mrf.mxu2 }
  0xc2   : > { %v392_v36 = vpop.f32.mrf.mxu3  ;;  %v337_v37 = vpop.f32.mrf.mxu0  ;;  %v374_v52 = vadd.f32 %v373_v34, %v282_v26 }
  0xc3   : > { %v338_v38 = vadd.f32 %v337_v37, %v287_v32  ;;  %v356_v39 = vpop.f32.mrf.mxu1  ;;  %v393_v57 = vadd.f32 %v392_v36, %v282_v26 }
  0xc4   : > { %v357_v42 = vadd.f32 %v356_v39, %v287_v32  ;;  %v407_v2 = vmax.f32 %v374_v52, 0.0 }
  0xc5   : > { %v409_v46 = vmax.f32 %v338_v38, 0.0  ;;  %v408_v7 = vmax.f32 %v393_v57, 0.0 }
  0xc6   : > { %v410_v48 = vmax.f32 %v357_v42, 0.0 }
  0xc7   : > { %v421_v49 = vpack.c.bf16 %v409_v46, %v405_v45 }
  0xc8   : > { %v422_v53 = vpack.c.bf16 %v410_v48, %v406_v47  ;;  %v442_v47 = vpop.permute.xlu0 %441 }
  0xc9   : > { %v375_v58 = vpop.f32.mrf.mxu2  ;;  %472 = vmatpush.bf16.msrb.mxu0 %v421_v49 }
  0xca   : > { %v376_v60 = vadd.f32 %v375_v58, %v287_v32  ;;  %v394_v61 = vpop.f32.mrf.mxu3  ;;  %491 = vmatpush.bf16.msrb.mxu1 %v422_v53 }
  0xcb   : > { %v395_v63 = vadd.f32 %v394_v61, %v287_v32 }
  0xcc   : > { %v411_v3 = vmax.f32 %v376_v60, 0.0 }
  0xcd   : > { %v412_v8 = vmax.f32 %v395_v63, 0.0  ;;  %473 = vmatpush.bf16.msrb.mxu0 %v417_v0  ;;  %v447_v63 = vpop.permute.xlu1 %446 }
  0xce   : > { %492 = vmatpush.bf16.msrb.mxu1 %v418_v4  ;;  %v423_v10 = vpack.c.bf16 %v411_v3, %v407_v2 }
  0xcf   : > { %v424_v12 = vpack.c.bf16 %v412_v8, %v408_v7 }
  0xd0   : > { %510 = vmatpush.bf16.msrb.mxu2 %v423_v10  ;;  %755 = vmatmul.msk.bf16.vlgmr.msrb.gmra.mxu0 %vm459_vm3, %v768_v5 }
  0xd1   : > { %529 = vmatpush.bf16.msrb.mxu3 %v424_v12  ;;  %757 = vmatmul.msk.bf16.vlgmr.msrb.gmra.mxu1 %vm459_vm3, %v768_v5 }
  0xd4   : > { %511 = vmatpush.bf16.msrb.mxu2 %v419_v16 }
  0xd5   : > { %530 = vmatpush.bf16.msrb.mxu3 %v420_v17 }
  0xd7   : > { %759 = vmatmul.msk.bf16.vlgmr.msrb.gmra.mxu2 %vm459_vm3, %v768_v5 }
  0xd8   : > { %761 = vmatmul.msk.bf16.vlgmr.msrb.gmra.mxu3 %vm459_vm3, %v768_v5 }
  0xe0   : > { %756 = vmatmul.msk.bf16.gmra.mxu0 %vm459_vm3, %v769_v18 }
  0xe1   : > { %758 = vmatmul.msk.bf16.gmra.mxu1 %vm459_vm3, %v769_v18 }
  0xe7   : > { %760 = vmatmul.msk.bf16.gmra.mxu2 %vm459_vm3, %v769_v18 }
  0xe8   : > { %762 = vmatmul.msk.bf16.gmra.mxu3 %vm459_vm3, %v769_v18 }
 0x14d   : > { %v475_v19 = vpop.f32.mrf.mxu0 }
 0x14e   : > { %v494_v20 = vpop.f32.mrf.mxu1  ;;  %v476_v22 = vadd.f32 %v475_v19, %v432_v21  ;;  %v558_v19 = vld [vmem:[#allocation2] sm:$0xff] }
 0x14f   : > { %v495_v23 = vadd.f32 %v494_v20, %v432_v21 }
 0x150   : > { %v542_v26 = vmax.f32 %v476_v22, 0.0  ;;  %v559_v22 = vld [vmem:[#allocation2 + $0x8] sm:$0xff] }
 0x151   : > { %v543_v27 = vmax.f32 %v495_v23, 0.0 }
 0x153   : > { %v562_v32 = vadd.f32 %v543_v27, %v542_v26 }
 0x155   : > { %v477_v24 = vpop.f32.mrf.mxu0 }
 0x156   : > { %v496_v25 = vpop.f32.mrf.mxu1  ;;  %v478_v34 = vadd.f32 %v477_v24, %v437_v29 }
 0x157   : > { %v497_v35 = vadd.f32 %v496_v25, %v437_v29  ;;  %v560_v25 = vld [vmem:[#allocation2 + $0x10] sm:$0xff] }
 0x158   : > { %v546_v41 = vmax.f32 %v478_v34, 0.0 }
 0x159   : > { %v547_v42 = vmax.f32 %v497_v35, 0.0 }
 0x15a   : > { %v513_v28 = vpop.f32.mrf.mxu2 }
 0x15b   : > { %v532_v30 = vpop.f32.mrf.mxu3  ;;  %v514_v31 = vadd.f32 %v513_v28, %v432_v21  ;;  %v567_v52 = vadd.f32 %v547_v42, %v546_v41  ;;  %v561_v28 = vld [vmem:[#allocation2 + $0x18] sm:$0xff] }
 0x15c   : > { %v533_v33 = vadd.f32 %v532_v30, %v432_v21 }
 0x15d   : > { %v544_v36 = vmax.f32 %v514_v31, 0.0  ;;  %v480_v38 = vpop.f32.mrf.mxu0 }
 0x15e   : > { %v545_v37 = vmax.f32 %v533_v33, 0.0  ;;  %v499_v40 = vpop.f32.mrf.mxu1  ;;  %v481_v49 = vadd.f32 %v480_v38, %v442_v47 }
 0x15f   : > { %v563_v39 = vadd.f32 %v562_v32, %v544_v36  ;;  %v500_v50 = vadd.f32 %v499_v40, %v442_v47 }
 0x160   : > { %v550_v55 = vmax.f32 %v481_v49, 0.0 }
 0x161   : > { %v564_v43 = vadd.f32 %v563_v39, %v545_v37  ;;  %v551_v56 = vmax.f32 %v500_v50, 0.0 }
 0x162   : > { %v515_v44 = vpop.f32.mrf.mxu2 }
 0x163   : > { %v534_v45 = vpop.f32.mrf.mxu3  ;;  %v516_v46 = vadd.f32 %v515_v44, %v437_v29  ;;  %565 = vadd.xlane.f32.xlu2 %v564_v43  ;;  %v572_v1 = vadd.f32 %v551_v56, %v550_v55 }
 0x164   : > { %v535_v48 = vadd.f32 %v534_v45, %v437_v29 }
 0x165   : > { %v548_v51 = vmax.f32 %v516_v46, 0.0  ;;  %v482_v57 = vpop.f32.mrf.mxu0 }
 0x166   : > { %v549_v53 = vmax.f32 %v535_v48, 0.0  ;;  %v501_v59 = vpop.f32.mrf.mxu1  ;;  %v483_v2 = vadd.f32 %v482_v57, %v447_v63 }
 0x167   : > { %v568_v54 = vadd.f32 %v567_v52, %v548_v51  ;;  %v502_v3 = vadd.f32 %v501_v59, %v447_v63 }
 0x168   : > { %v554_v7 = vmax.f32 %v483_v2, 0.0 }
 0x169   : > { %v569_v58 = vadd.f32 %v568_v54, %v549_v53  ;;  %v555_v8 = vmax.f32 %v502_v3, 0.0 }
 0x16a   : > { %v518_v60 = vpop.f32.mrf.mxu2 }
 0x16b   : > { %v519_v61 = vadd.f32 %v518_v60, %v442_v47  ;;  %v537_v62 = vpop.f32.mrf.mxu3  ;;  %570 = vadd.xlane.f32.xlu0 %v569_v58  ;;  %v577_v14 = vadd.f32 %v555_v8, %v554_v7 }
 0x16c   : > { %v538_v0 = vadd.f32 %v537_v62, %v442_v47 }
 0x16d   : > { %v552_v4 = vmax.f32 %v519_v61, 0.0 }
 0x16e   : > { %v553_v6 = vmax.f32 %v538_v0, 0.0 }
 0x16f   : > { %v573_v5 = vadd.f32 %v572_v1, %v552_v4 }
 0x171   : > { %v574_v9 = vadd.f32 %v573_v5, %v553_v6 }
 0x172   : > { %v520_v10 = vpop.f32.mrf.mxu2 }
 0x173   : > { %v521_v11 = vadd.f32 %v520_v10, %v447_v63  ;;  %v539_v12 = vpop.f32.mrf.mxu3  ;;  %575 = vadd.xlane.f32.xlu1 %v574_v9 }
 0x174   : > { %v540_v13 = vadd.f32 %v539_v12, %v447_v63 }
 0x175   : > { %v556_v15 = vmax.f32 %v521_v11, 0.0 }
 0x176   : > { %v557_v17 = vmax.f32 %v540_v13, 0.0 }
 0x177   : > { %v578_v16 = vadd.f32 %v577_v14, %v556_v15 }
 0x179   : > { %v579_v18 = vadd.f32 %v578_v16, %v557_v17 }
 0x17b   : > { %580 = vadd.xlane.f32.xlu2 %v579_v18 }
 0x1d6   : > { %v566_v20 = vpop.xlane.xlu2 %565 }
 0x1d7   : > { %v582_v21 = vadd.f32 %v566_v20, %v558_v19 }
 0x1d9   : > { %587 = vst.msk [vmem:[#allocation2] sm:$0xff] %vm586_vm4, %v582_v21 }
 0x1de   : > { %v571_v23 = vpop.xlane.xlu0 %570 }
 0x1df   : > { %v583_v24 = vadd.f32 %v571_v23, %v559_v22 }
 0x1e1   : > { %588 = vst.msk [vmem:[#allocation2 + $0x8] sm:$0xff] %vm586_vm4, %v583_v24 }
 0x1e6   : > { %v576_v26 = vpop.xlane.xlu1 %575 }
 0x1e7   : > { %v584_v27 = vadd.f32 %v576_v26, %v560_v25 }
 0x1e9   : > { %589 = vst.msk [vmem:[#allocation2 + $0x10] sm:$0xff] %vm586_vm4, %v584_v27 }
 0x1ed   : > { %594 = sbr.rel (%p763_p1) target bundleno = 667 (0x29b), region = 48 }
 0x1ee   : > { %v581_v29 = vpop.xlane.xlu2 %580 }
 0x1ef   : > { %v585_v30 = vadd.f32 %v581_v29, %v561_v28 }
 0x1f1   : > { %590 = vst.msk [vmem:[#allocation2 + $0x18] sm:$0xff] %vm586_vm4, %v585_v30 }
 0x1f2   : > { %v595_v31 = vld [vmem:[#allocation2] sm:$0xff]  ;;  %v596_v33 = vld [vmem:[#allocation2 + $0x8] sm:$0xff]  ;;  %v597_v35 = vld [vmem:[#allocation2 + $0x10] sm:$0xff]  ;;  %vm635_vm5 = vcmask 253952  }
 0x1f3   : > { %v599_v32 = vmul.f32 0.0009765625, %v595_v31  ;;  %v600_v34 = vmul.f32 0.0009765625, %v596_v33  ;;  %v601_v36 = vmul.f32 0.0009765625, %v597_v35 }
 0x1f5   : > { %603 = vxpose.xlu0.b32.start [1/4] (short) (narrow) %v599_v32, 8 }
 0x1f8   : > { %v598_v37 = vld [vmem:[#allocation2 + $0x18] sm:$0xff] }
 0x1f9   : > { %v602_v38 = vmul.f32 0.0009765625, %v598_v37 }
 0x1fd   : > { %604 = vxpose.xlu0.b32.cont [2/4] (short) (narrow) %v600_v34, 8 }
 0x205   : > { %605 = vxpose.xlu0.b32.cont [3/4] (short) (narrow) %v601_v36, 8 }
 0x20d   : > { %606 = vxpose.xlu0.b32.end [4/4] (short) (narrow) %v602_v38, 8 }
 0x299   : > { %v619_v39 = vpop.trf.xlu0 }
 0x29a   : > { %636 = vst.msk [vmem:[%s1053_s27] sm:$0x1] %vm635_vm5, %v619_v39 }
 0x29b PF: > { %s646_s14 = scalar_lea.hbm %s1160_s5, %s929_s22  ;;  %s648_s15 = sshll.u32 %s1053_s27, 4  ;;  %s649_s15 = int_to_ptr.vmem [resolvable:$true] %s648_s15 }
 0x29c   : > { %s650_s16 = sshll.u32 %s646_s14, 4  ;;  %s638_s17 = scalar_lea.sflag [#allocation4], %s238_s10  ;;  %s651_s16 = int_to_ptr.hbm [resolvable:$true] %s650_s16 }
 0x29d   : > { %s861_s26 = sshra.s32 %s651_s16, 4  ;;  %s867_s12 = scalar_lea.hbm %s1160_s5, 2  ;;  %s862_s26 = int_to_ptr.hbm [resolvable:$true] %s861_s26 }
 0x29e   : > { %s863_s7 = scalar_lea.hbm %s862_s26, 1  ;;  %p868_p6 = scmp.lt.s32.totalorder %s862_s26, %s1160_s5 }
 0x29f   : > { %p864_p2 = scmp.ne.s32.totalorder %s862_s26, %s863_s7  ;;  %p869_p7 = scmp.lt.s32.totalorder %s867_s12, %s863_s7 }
 0x2a1   : > { %p865_p4 = pnand %p864_p2, %p1024_p3  ;;  %p870_p8 = por %p869_p7, %p868_p6 }
 0x2a3   : > { %p866_p5 = pneg %p865_p4 }
 0x2a5   : > { %p871_p10 = pnand %p870_p8, %p866_p5 }
 0x2a7   : > { %874 = shalt.err (!%p871_p10)
}
 0x2a8   : > { %770 = dma.vmem_to_hbm [thread:$0]  (%p1024_p3), %s649_s15, 16, %s651_s16, %s638_s17  }
 0x2a9 PF: > { %p776_p11 = scmp.ge.s32.totalorder %s941_s25, 2  ;;  %s662_s22 = sand.u32 1, %s913_s18  }
 0x2aa   : > { %s663_s10 = scalar_lea.sflag [#allocation4], %s662_s22 }
 0x2ab   : > { %p773_p12 = pnand %p776_p11, %p1034_p9 }
 0x2ad   : > { %p774_p13 = pneg %p773_p12 }
 0x2af   : > { %908 = dma.done.wait (%p774_p13), %s663_s10, 16  }
 0x2b0   : > { %910 = vsyncadd (%p774_p13), %s663_s10, 4294967280  ;;  %s18_s25 = sadd.s32 1, %s941_s25   ;;  %s1163_s18 = smov %s917_s19 }
 0x2b1   : > { %p15_p0 = scmp.ge.s32.totalorder %s18_s25, 6   ;;  %s1164_s19 = smov %s921_s20 }
 0x2b2   : > { %s1165_s20 = smov %s1042_s9  ;;  %s1166_s21 = smov %s933_s23 }
 0x2b3   : > { %s1167_s22 = smov %s937_s24  ;;  %s1168_s23 = smov %s1171_s28 }
 0x2b4   : > { %s1169_s24 = smov %s1175_s29  ;;  %17 = sbr.rel (!%p15_p0) target bundleno = 5 (0x5), region = 83 }
 0x2b9   :  { %668 = vsyncpa [#allocation4], 1 }
 0x2ba   :  { %670 = vsyncpa [#allocation4 + $0x1], 1 }

</bundles_post_ra>
